<compile_context>
chip_gen: v7x
topology: tpu7x:2x2x1
jax: 0.10.0
libtpu: 0.0.40
codegen_flags: <defaults>
</compile_context>

<pallas_src>
import math
import jax
import jax.numpy as jnp
from jax.experimental import pallas as pl
from jax.experimental.pallas import tpu as pltpu


def _round_up(x, m):
    return ((x + m - 1) // m) * m


def attention_pooling_kernel(x_ref, w_ref, z_ref):
    # One MXU matmul per N-tile: (block_n, C_pad) @ (C_pad, M_pad) -> (block_n, M_pad).
    # Biases are folded into w via the appended ones column of x, so there is no
    # per-tile broadcast add (no VPU work at all besides the f32->f32 cast).
    z_ref[...] = jnp.dot(
        x_ref[...], w_ref[...], preferred_element_type=jnp.float32
    ).astype(z_ref.dtype)


def attention_pooling_pallas(xs, params, *, max_block_n=512,
                             vmem_budget_bytes=24 << 20):
    """xs: list of (N, C_i) float arrays; params: dict of unpadded parameters."""
    N = int(xs[0].shape[0])
    M = int(params['proj_b'][0].shape[0])
    c_total = sum(int(x.shape[1]) for x in xs)
    C_aug = c_total + 1                                    # +1 ones column for the bias

    # lane-dense padding (multiples of 128 on the last dims)
    C_pad = _round_up(max(C_aug, 128), 128)
    M_pad = _round_up(max(M, 128), 128)

    # ---- packing (plain-JAX glue) ----
    x_cat = jnp.concatenate(
        [x.astype(jnp.float32) for x in xs] + [jnp.ones((N, 1), jnp.float32)],
        axis=1)                                            # (N, C_aug)
    b_sum = sum(b.astype(jnp.float32) for b in params['proj_b'])
    w_cat = jnp.concatenate(
        [w.astype(jnp.float32) for w in params['proj_w']] + [b_sum[None, :]],
        axis=0)                                            # (C_aug, M)

    # ---- choose an N tile that fits the VMEM budget (v7x: 64 MiB / TC) ----
    n_ceil8 = _round_up(max(N, 1), 8)
    per_row = 4 * (2 * C_pad + 2 * M_pad)                  # x + out, double-buffered
    fixed = 2 * 4 * C_pad * M_pad                          # resident (double-buffered) weight
    fit = max(8, (vmem_budget_bytes - fixed) // per_row)
    block_n = min(max_block_n, fit, n_ceil8)
    block_n = max(8, (block_n // 8) * 8)
    N_pad = _round_up(n_ceil8, block_n)

    x_pack = jnp.zeros((N_pad, C_pad), jnp.float32).at[:N, :C_aug].set(x_cat)
    w_pack = jnp.zeros((C_pad, M_pad), jnp.float32).at[:C_aug, :M].set(w_cat)
    # TODO(synk): for memory-bound configs on v6e/v7x, stage x_pack/w_pack in bf16
    # (keep preferred_element_type=f32); kept f32 here to hold the 1e-5 tolerance.

    grid = (N_pad // block_n,)
    cost = pl.CostEstimate(
        flops=2 * N_pad * C_pad * M_pad,
        transcendentals=0,
        bytes_accessed=4 * (N_pad * C_pad + C_pad * M_pad + N_pad * M_pad))

    z = pl.pallas_call(
        attention_pooling_kernel,
        out_shape=jax.ShapeDtypeStruct((N_pad, M_pad), jnp.float32),
        grid=grid,
        in_specs=[
            pl.BlockSpec((block_n, C_pad), lambda i: (i, 0)),   # x: pipelined over N
            pl.BlockSpec((C_pad, M_pad), lambda i: (0, 0)),     # weights: VMEM-resident
        ],
        out_specs=pl.BlockSpec((block_n, M_pad), lambda i: (i, 0)),
        compiler_params=pltpu.CompilerParams(
            dimension_semantics=("parallel",),     # megacore-shards the batch on v7x
            vmem_limit_bytes=32 << 20),
        cost_estimate=cost,
    )(x_pack, w_pack)

    return z[:N, :M]


def attention_pooling_reference(xs, params):
    """Pure-JAX mirror of the PyTorch forward (for correctness checking)."""
    hs = [x @ w + b for x, w, b in zip(xs, params['proj_w'], params['proj_b'])]
    h = jnp.stack(hs, axis=-2)                                  # (N, K, M)
    av = jnp.tanh(h @ params['wv'] + params['bv'])              # (N, K, L)
    au = jax.nn.sigmoid(h @ params['wu'] + params['bu'])        # (N, K, L)
    a = (av * au) @ params['ww'] + params['bw']                 # (N, K, 1)
    a = jnp.swapaxes(a, -1, -2)                                 # (N, 1, K)
    a = jax.nn.softmax(a, axis=1)                               # softmax over singleton dim (as in torch)
    z = jnp.matmul(a, h)                                        # (N, 1, M)
    return z[:, 0, :]                                           # (N, M)


def make_params(key, in_dim, out_dim, shared_dim):
    """Deterministic synthetic parameters (torch-Linear-like uniform init)."""
    keys = jax.random.split(key, 2 * len(in_dim) + 6)
    proj_w, proj_b = [], []
    for i, c in enumerate(in_dim):
        bound = 1.0 / math.sqrt(c)
        proj_w.append(jax.random.uniform(keys[2 * i], (c, out_dim),
                                         minval=-bound, maxval=bound, dtype=jnp.float32))
        proj_b.append(jax.random.uniform(keys[2 * i + 1], (out_dim,),
                                         minval=-bound, maxval=bound, dtype=jnp.float32))
    o = 2 * len(in_dim)
    bm = 1.0 / math.sqrt(out_dim)
    bl = 1.0 / math.sqrt(shared_dim)
    params = {
        'proj_w': proj_w,
        'proj_b': proj_b,
        'wv': jax.random.uniform(keys[o + 0], (out_dim, shared_dim), minval=-bm, maxval=bm, dtype=jnp.float32),
        'bv': jax.random.uniform(keys[o + 1], (shared_dim,), minval=-bm, maxval=bm, dtype=jnp.float32),
        'wu': jax.random.uniform(keys[o + 2], (out_dim, shared_dim), minval=-bm, maxval=bm, dtype=jnp.float32),
        'bu': jax.random.uniform(keys[o + 3], (shared_dim,), minval=-bm, maxval=bm, dtype=jnp.float32),
        'ww': jax.random.uniform(keys[o + 4], (shared_dim, 1), minval=-bl, maxval=bl, dtype=jnp.float32),
        'bw': jax.random.uniform(keys[o + 5], (1,), minval=-bl, maxval=bl, dtype=jnp.float32),
    }
    return params


if __name__ == "__main__":
    # small shapes consistent with the module: 3 feature sources of different dims
    N = 8                       # batch
    in_dim = (16, 32, 24)       # C_i per source
    out_dim = 32                # M
    shared_dim = 16             # L

    key = jax.random.PRNGKey(0)
    kx, kp = jax.random.split(key)
    xkeys = jax.random.split(kx, len(in_dim))
    xs = [jax.random.normal(k, (N, c), dtype=jnp.float32)
          for k, c in zip(xkeys, in_dim)]
    params = make_params(kp, in_dim, out_dim, shared_dim)

    z = attention_pooling_pallas(xs, params)
    z = jax.block_until_ready(z)

    z_ref = jax.block_until_ready(attention_pooling_reference(xs, params))
    assert z.shape == (N, out_dim)
    assert jnp.allclose(z, z_ref, atol=1e-5, rtol=1e-5), "mismatch vs reference"

    print("KERNEL_OK")
</pallas_src>

<mosaic_0001>
module attributes {stable_mosaic.version = 11 : i64} {
  func.func @attention_pooling_kernel(%arg0: i32, %arg1: memref<8x128xf32, #tpu.memory_space<vmem>>, %arg2: memref<128x128xf32, #tpu.memory_space<vmem>>, %arg3: memref<8x128xf32, #tpu.memory_space<vmem>>) attributes {dimension_semantics = [#tpu.dimension_semantics<parallel>], iteration_bounds = array<i64: 1>, scalar_prefetch = 0 : i64, scratch_operands = 0 : i64, tpu.core_type = #tpu.core_type<tc>, window_params = [{transform_indices = @transform_0, window_bounds = array<i64: 8, 128>}, {pipeline_mode = #tpu.pipeline_mode<synchronous>, transform_indices = @transform_1, window_bounds = array<i64: 128, 128>}, {transform_indices = @transform_2, window_bounds = array<i64: 8, 128>}]} {
    %c0 = arith.constant 0 : index
    %c0_0 = arith.constant 0 : index
    %0 = vector.load %arg1[%c0, %c0_0] : memref<8x128xf32, #tpu.memory_space<vmem>>, vector<8x128xf32>
    %c0_1 = arith.constant 0 : index
    %c0_2 = arith.constant 0 : index
    %1 = vector.load %arg2[%c0_1, %c0_2] : memref<128x128xf32, #tpu.memory_space<vmem>>, vector<128x128xf32>
    %cst = arith.constant dense<0.000000e+00> : vector<8x128xf32>
    %2 = tpu.matmul %0, %1, %cst {dimension_numbers = #tpu.dot_dimension_numbers<[1], [0], [0], [1], [0, 0, 1, 1], [], []>} : vector<8x128xf32>, vector<128x128xf32>, vector<8x128xf32> -> vector<8x128xf32>
    %c0_3 = arith.constant 0 : index
    %c0_4 = arith.constant 0 : index
    %3 = vector.load %arg3[%c0_3, %c0_4] : memref<8x128xf32, #tpu.memory_space<vmem>>, vector<8x128xf32>
    tpu.vector_store %arg3[%c0_3, %c0_4], %2 {strides = array<i32>} : memref<8x128xf32, #tpu.memory_space<vmem>>, vector<8x128xf32>,
    return
  }
  func.func @transform_0(%arg0: i32) -> (i32, i32) {
    %c0_i32 = arith.constant 0 : i32
    %c0_i32_0 = arith.constant 0 : i32
    return %arg0, %c0_i32 : i32, i32
  }
  func.func @transform_1(%arg0: i32) -> (i32, i32) {
    %c0_i32 = arith.constant 0 : i32
    %c0_i32_0 = arith.constant 0 : i32
    %c0_i32_1 = arith.constant 0 : i32
    return %c0_i32, %c0_i32_0 : i32, i32
  }
  func.func @transform_2(%arg0: i32) -> (i32, i32) {
    %c0_i32 = arith.constant 0 : i32
    %c0_i32_0 = arith.constant 0 : i32
    return %arg0, %c0_i32 : i32, i32
  }
}

</mosaic_0001>

<bundles_post_ra>
// kernel: tpu_custom_call.1
= control target key start
LH: loop header
LB: loop body
LE: loop exit
PB: predicated region body
PF: predicated region fallthrough
CT: control target
= control target key end

     0   :  { %7 = vsyncpa [#allocation3], 0  ;;  %s364_s0 = inlined_call_operand.hbm [shape: f32[8,128], index: 0, kind: input, shape index: {}]   ;;  %s365_s1 = inlined_call_operand.hbm [shape: f32[128,128], index: 1, kind: input, shape index: {}]   ;;  %s366_s2 = inlined_call_operand.hbm [shape: f32[8,128], index: 2, kind: output, shape index: {}]  }
   0x1   :  { %8 = vsyncpa [#allocation6], 0 }
   0x2   :  { %9 = vsyncpa [#allocation4], 0  ;;  %s298_s9 = smov [#allocation2]   ;;  %s299_s11 = smov [#allocation5]  }
   0x3   :  { %s16_s10 = sshll.u32 %s298_s9, 4  ;;  %s25_s12 = sshll.u32 %s299_s11, 4  ;;  %s17_s10 = int_to_ptr.vmem [resolvable:$true] %s16_s10  ;;  %s321_s12 = int_to_ptr.vmem [resolvable:$true] %s25_s12 }
   0x4   :  { %s226_s15 = scalar_lea.hbm %s364_s0, 128 }
   0x5   :  { %p227_p0 = scmp.ne.s32.totalorder %s364_s0, %s226_s15  ;;  %p230_p1 = scmp.lt.u32.totalorder %s226_s15, %s364_s0 }
   0x7   :  { %p232_p2 = pnand %p230_p1, %p227_p0 }
   0x9   :  { %235 = shalt.err (!%p232_p2)
}
   0xa   :  { %s236_s20 = scalar_lea.vmem %s17_s10, 128  ;;  %p241_p4 = scmp.lt.s32.totalorder %s17_s10, %s17_s10 }
   0xb   :  { %p237_p3 = scmp.ne.s32.totalorder %s17_s10, %s236_s20  ;;  %p242_p5 = scmp.lt.s32.totalorder %s236_s20, %s236_s20 }
   0xd   :  { %p243_p6 = por %p242_p5, %p241_p4 }
   0xf   :  { %p244_p7 = pnand %p243_p6, %p237_p3 }
  0x11   :  { %247 = shalt.err (!%p244_p7)
}
  0x12   :  { %19 = dma.hbm_to_vmem [thread:$0]  %s364_s0, 128, %s17_s10, [#allocation3]  }
  0x13   :  { %s248_s25 = scalar_lea.hbm %s365_s1, 2048 }
  0x14   :  { %p249_p8 = scmp.ne.s32.totalorder %s365_s1, %s248_s25  ;;  %p252_p9 = scmp.lt.u32.totalorder %s248_s25, %s365_s1 }
  0x16   :  { %p254_p10 = pnand %p252_p9, %p249_p8 }
  0x18   :  { %257 = shalt.err (!%p254_p10)
}
  0x19   :  { %s258_s30 = scalar_lea.vmem %s321_s12, 2048  ;;  %p263_p12 = scmp.lt.s32.totalorder %s321_s12, %s321_s12 }
  0x1a   :  { %p259_p11 = scmp.ne.s32.totalorder %s321_s12, %s258_s30  ;;  %p264_p13 = scmp.lt.s32.totalorder %s258_s30, %s258_s30 }
  0x1c   :  { %p265_p0 = por %p264_p13, %p263_p12 }
  0x1e   :  { %p266_p1 = pnand %p265_p0, %p259_p11 }
  0x20   :  { %269 = shalt.err (!%p266_p1)
}
  0x21   :  { %s300_s0 = smov 128   ;;  %s301_s3 = smov 8  }
  0x22   :  { %31 = dma.hbm_to_vmem [thread:$0]  %s365_s1, 2048, %s321_s12, [#allocation6], %s300_s0, %s300_s0, %s301_s3  }
  0x23   :  { %292 = dma.done.wait [#allocation3], 128  }
  0x24   :  { %293 = vsyncadd [#allocation3], 4294967168 }
  0x25   :  { %294 = dma.done.wait [#allocation6], 2048  }
  0x26   :  { %295 = vsyncadd [#allocation6], 4294965248  ;;  %v302_v0 = vmov 0.0|0.0   ;;  %vm303_vm0 = vmmov 0   ;;  %v304_v1 = vmov 0.0   ;;  %v39_v2 = vld [vmem:[#allocation5] sm:$0xff] }
  0x27   :  { %194 = vmatprep.subr.bf16.mxu0 %v302_v0  ;;  %191 = vmatprep.mubr.msk.f32.mxu0 %vm303_vm0, %v304_v1  ;;  %v40_v3 = vld [vmem:[#allocation5 + $0x8] sm:$0xff]  ;;  %v41_v4 = vld [vmem:[#allocation5 + $0x10] sm:$0xff]  ;;  %v42_v6 = vld [vmem:[#allocation5 + $0x18] sm:$0xff]  ;;  %s305_s1 = smov [#allocation7]  }
  0x28   :  { %v195_v5 = vpack.c.bf16 %v40_v3, %v39_v2  ;;  %v198_v7 = vpack.c.bf16 %v42_v6, %v41_v4  ;;  %v43_v8 = vld [vmem:[#allocation5 + $0x20] sm:$0xff]  ;;  %v44_v9 = vld [vmem:[#allocation5 + $0x28] sm:$0xff]  ;;  %v45_v11 = vld [vmem:[#allocation5 + $0x30] sm:$0xff]  ;;  %s132_s6 = sshll.u32 %s305_s1, 4  ;;  %s133_s6 = int_to_ptr.vmem [resolvable:$true] %s132_s6 }
  0x29   :  { %v201_v10 = vpack.c.bf16 %v44_v9, %v43_v8  ;;  %v46_v12 = vld [vmem:[#allocation5 + $0x38] sm:$0xff]  ;;  %v47_v14 = vld [vmem:[#allocation5 + $0x40] sm:$0xff]  ;;  %v48_v15 = vld [vmem:[#allocation5 + $0x48] sm:$0xff]  ;;  %s270_s7 = scalar_lea.vmem %s133_s6, 128  ;;  %p275_p3 = scmp.lt.s32.totalorder %s133_s6, %s133_s6 }
  0x2a   :  { %196 = vmatpush3.bf16.msra.mxu0 %v195_v5  ;;  %v204_v13 = vpack.c.bf16 %v46_v12, %v45_v11  ;;  %v207_v16 = vpack.c.bf16 %v48_v15, %v47_v14  ;;  %v49_v17 = vld [vmem:[#allocation5 + $0x50] sm:$0xff]  ;;  %v50_v18 = vld [vmem:[#allocation5 + $0x58] sm:$0xff]  ;;  %v51_v20 = vld [vmem:[#allocation5 + $0x60] sm:$0xff]  ;;  %p271_p2 = scmp.ne.s32.totalorder %s133_s6, %s270_s7  ;;  %p276_p4 = scmp.lt.s32.totalorder %s270_s7, %s270_s7 }
  0x2b   :  { %197 = vmatprep.subr.bf16.mxu0 %v302_v0  ;;  %v210_v19 = vpack.c.bf16 %v50_v18, %v49_v17  ;;  %v52_v21 = vld [vmem:[#allocation5 + $0x68] sm:$0xff]  ;;  %v53_v23 = vld [vmem:[#allocation5 + $0x70] sm:$0xff]  ;;  %v54_v24 = vld [vmem:[#allocation5 + $0x78] sm:$0xff] }
  0x2c   :  { %v213_v22 = vpack.c.bf16 %v52_v21, %v51_v20  ;;  %v216_v25 = vpack.c.bf16 %v54_v24, %v53_v23  ;;  %v38_v26 = vld [vmem:[#allocation2] sm:$0xff]  ;;  %p277_p5 = por %p276_p4, %p275_p3 }
  0x2e   :  { %199 = vmatpush3.bf16.msra.mxu0 %v198_v7  ;;  %p278_p6 = pnand %p277_p5, %p271_p2 }
  0x2f   :  { %200 = vmatprep.subr.bf16.mxu0 %v302_v0 }
  0x32   :  { %202 = vmatpush3.bf16.msra.mxu0 %v201_v10 }
  0x33   :  { %203 = vmatprep.subr.bf16.mxu0 %v302_v0 }
  0x36   :  { %205 = vmatpush3.bf16.msra.mxu0 %v204_v13 }
  0x37   :  { %206 = vmatprep.subr.bf16.mxu0 %v302_v0 }
  0x3a   :  { %208 = vmatpush3.bf16.msra.mxu0 %v207_v16 }
  0x3b   :  { %209 = vmatprep.subr.bf16.mxu0 %v302_v0 }
  0x3e   :  { %211 = vmatpush3.bf16.msra.mxu0 %v210_v19 }
  0x3f   :  { %212 = vmatprep.subr.bf16.mxu0 %v302_v0 }
  0x42   :  { %214 = vmatpush3.bf16.msra.mxu0 %v213_v22 }
  0x43   :  { %215 = vmatprep.subr.bf16.mxu0 %v302_v0 }
  0x46   :  { %217 = vmatpush3.bf16.msra.mxu0 %v216_v25 }
  0x49   :  { %192 = vmatmul.mubr.f32.vlgmr.msra.gmra.mrb[0].mxu0 %v38_v26 }
 0x11c   :  { %v121_v27 = vpop.f32.mrb[0].mxu0 }
 0x11d   :  { %125 = vst [vmem:[#allocation7] sm:$0xff] %v121_v27  ;;  %v193_v28 = vpop.f32.mrb[1].mxu0 }
 0x11e   :  { %281 = shalt.err (!%p278_p6)
}
 0x11f   :  { %s282_s10 = scalar_lea.hbm %s366_s2, 128 }
 0x120   :  { %p283_p7 = scmp.ne.s32.totalorder %s366_s2, %s282_s10  ;;  %p286_p8 = scmp.lt.u32.totalorder %s282_s10, %s366_s2 }
 0x122   :  { %p288_p9 = pnand %p286_p8, %p283_p7 }
 0x124   :  { %291 = shalt.err (!%p288_p9)
}
 0x125   :  { %135 = dma.vmem_to_hbm [thread:$0]  %s133_s6, 128, %s366_s2, [#allocation4]  }
 0x126   :  { %296 = dma.done.wait [#allocation4], 128  }
 0x127   :  { %297 = vsyncadd [#allocation4], 4294967168 }
 0x128   :  { %139 = vsyncpa [#allocation3], 1 }
 0x129   :  { %140 = vsyncpa [#allocation6], 1 }
 0x12a   :  { %141 = vsyncpa [#allocation4], 1 }

</bundles_post_ra>
